<compile_context>
chip_gen: v7x
topology: tpu7x:2x2x1
jax: 0.10.0
libtpu: 0.0.40
codegen_flags: <defaults>
</compile_context>

<pallas_src>
import functools

import numpy as np
import jax
import jax.numpy as jnp
from jax.experimental import pallas as pl
from jax.experimental.pallas import tpu as pltpu

# ----------------------------------------------------------------------------
# Host-side (numpy) precomputation of static quantum gates — glue, not hot path
# ----------------------------------------------------------------------------
_SQRT2 = np.sqrt(2.0)
_H2 = np.array([[1, 1], [1, -1]], dtype=np.complex64) / _SQRT2
_X2 = np.array([[0, 1], [1, 0]], dtype=np.complex64)
_I2 = np.eye(2, dtype=np.complex64)
_P0 = np.array([[1, 0], [0, 0]], dtype=np.complex64)
_P1 = np.array([[0, 0], [0, 1]], dtype=np.complex64)


def _bin_list(num, length):
    return [int(b) for b in format(num, "0{}b".format(length))]


def _all_H(nq):
    u = _H2
    for _ in range(1, nq):
        u = np.kron(u, _H2)
    return u


def _sign_matrix(nq):
    # matches get_static_RZ: MSB-first binary, flipped -> LSB-first, then -1+2*b
    binary = np.array([_bin_list(s, nq) for s in range(2 ** nq)], dtype=np.float32)
    binary = np.ascontiguousarray(binary[:, ::-1])
    return (-np.ones_like(binary) + 2.0 * binary).astype(np.float32)


def _states(nq):
    # matches get_static_state_list: MSB-first binary, float32
    return np.array([_bin_list(s, nq) for s in range(2 ** nq)], dtype=np.float32)


def _get_CNOT(control, target, nq):
    swap = True
    if control > target:
        swap = False
        control, target = target, control
    diff = target - control
    if diff > 1:
        scaler = np.eye(2 ** (diff - 1), dtype=np.complex64)
        upper = np.kron(scaler, _I2)
        lower = np.kron(scaler, _X2)
    else:
        upper = _I2
        lower = _X2
    unitary = np.kron(_P0, upper) + np.kron(_P1, lower)
    if swap:
        swap_matrix = _H2
        for _ in range(1, diff + 1):
            swap_matrix = np.kron(swap_matrix, _H2)
        unitary = swap_matrix @ unitary @ swap_matrix
    if nq > diff + 1:
        bits_before = control - 1
        bits_after = nq - target
        unitary = np.kron(
            np.eye(2 ** bits_after, dtype=np.complex64),
            np.kron(unitary, np.eye(2 ** bits_before, dtype=np.complex64)),
        )
    return unitary


def _cnot_ring(nq):
    u = _get_CNOT(1, 2, nq)
    for i in range(2, nq):
        u = _get_CNOT(i, i + 1, nq) @ u
    u = _get_CNOT(nq, 1, nq) @ u
    return u


def _rx_all(weights_flat, nq):
    def rx(t):
        c, s = np.cos(t / 2.0), np.sin(t / 2.0)
        return np.array([[c, -1j * s], [-1j * s, c]], dtype=np.complex64)

    u = rx(weights_flat[0])
    for i in range(1, nq):
        u = np.kron(rx(weights_flat[i]), u)
    return u


def _permutations(size, ksize):
    # only used by the literal numpy reference (the Pallas wrapper uses pure
    # reshape/transpose instead of these gathers)
    idx = np.arange(size * size // ksize)
    perm = (idx % size) * (size // ksize) + idx // size        # sub_part_permutation
    divisor = size // ksize
    pback = (idx % divisor) * size + idx // divisor            # permute_back
    return perm.astype(np.int32), pback.astype(np.int32)


# ----------------------------------------------------------------------------
# Pallas kernel: per-patch quantum circuit simulation (hot path, lane-dense)
# ----------------------------------------------------------------------------
def _qconv_kernel(x_ref, sgn_ref, w_ref, st_ref, o_ref, *, dim):
    nq = x_ref.shape[0]
    xh = 0.5 * x_ref[...]                                    # (nq, TP) = 0.5 * x
    sgn = sgn_ref[...]                                       # (dim, nq), entries +-1
    # L' = 0.5 * (sign @ x): K = nq is tiny, do it on the VPU (exact f32, frees MXU)
    lh = sgn[:, 0:1] * xh[0:1, :]                            # (dim, TP)
    for j in range(1, nq):
        lh = lh + sgn[:, j:j + 1] * xh[j:j + 1, :]
    qq = jnp.sum(xh * xh, axis=0, keepdims=True)             # (1, TP) = 0.25*sum_j x_j^2
    # Diagonal RZ + all RZZ layers collapse to a single per-basis-state phase:
    ang = qq - lh - lh * lh                                  # (dim, TP)
    cs = jnp.concatenate([jnp.cos(ang), jnp.sin(ang)], axis=0)   # (2*dim, TP)
    # One fused real matmul applying M = CNOT_ring @ RX (amp0 folded into W):
    #   [Re psi; Im psi] = amp0 * [[Re M, -Im M], [Im M, Re M]] @ [cos; sin]
    ps = jnp.dot(w_ref[...], cs, preferred_element_type=jnp.float32)  # (2*dim, TP)
    pr = ps[:dim, :]
    pi = ps[dim:, :]
    probs = pr * pr + pi * pi                                # |psi|^2, (dim, TP)
    # Measurement: out[m, p] = sum_s states[s, m] * probs[s, p]
    o_ref[...] = jnp.dot(st_ref[...], probs, preferred_element_type=jnp.float32)


def quantum_conv2d(x, weight, *, kernel_size=2, size=16, tile_p=None):
    """Pallas implementation of QuantumConv2d.forward. x: (B, 1, size, size)."""
    assert kernel_size == 2, "module's pixel-pair reshape logic is specific to 2x2 kernels"
    nq = kernel_size * kernel_size            # qubits per patch (4)
    dim = 2 ** nq                             # basis states (16)
    nb = size // kernel_size                  # patch blocks per side
    B = x.shape[0]
    P = B * nb * nb                           # number of 2x2 patches

    # --- patch extraction as pure reshape/transpose (no gathers); exactly matches
    #     sub_part_permutation: qubit index j = 2*ri + ci on sublanes, patches on lanes.
    xi = jnp.asarray(x, jnp.float32).reshape(B, nb, kernel_size, nb, kernel_size)
    xT = jnp.transpose(xi, (2, 4, 0, 1, 3)).reshape(nq, P)       # (nq, P)

    # --- static circuit operators (weight is a fixed parameter -> M is constant)
    sign = _sign_matrix(nq)                                      # (dim, nq), +-1
    states = _states(nq)                                         # (dim, nq), 0/1
    M = _cnot_ring(nq) @ _rx_all(np.asarray(weight, np.float32).reshape(-1), nq)
    amp0 = 2.0 ** (-nq / 2.0)                                    # H^{(x)n}|0..0> amplitude
    w_fused = np.block([[M.real, -M.imag],
                        [M.imag, M.real]]).astype(np.float32) * np.float32(amp0)
    sgn_j = jnp.asarray(sign, jnp.float32)                       # (dim, nq)
    w_j = jnp.asarray(w_fused, jnp.float32)                      # (2*dim, 2*dim)
    st_j = jnp.asarray(states.T, jnp.float32)                    # (nq, dim)

    # --- pad the (lane) patch axis to a multiple of 128 and pick a large tile
    P_pad = ((P + 127) // 128) * 128
    if P_pad != P:
        xT = jnp.pad(xT, ((0, 0), (0, P_pad - P)))               # padded patches -> garbage, sliced off below
    if tile_p is None:
        tile_p = min(P_pad, 4096)
        while P_pad % tile_p:
            tile_p -= 128
        # keep >= 2 grid steps when possible so the "parallel" axis can be split
        # across the 2 TensorCores on v7x
        if P_pad // tile_p == 1 and P_pad >= 256 and (P_pad // 2) % 128 == 0:
            tile_p = P_pad // 2
    assert tile_p % 128 == 0 and P_pad % tile_p == 0
    grid = (P_pad // tile_p,)

    out = pl.pallas_call(
        functools.partial(_qconv_kernel, dim=dim),
        out_shape=jax.ShapeDtypeStruct((nq, P_pad), jnp.float32),
        grid_spec=pltpu.PrefetchScalarGridSpec(
            num_scalar_prefetch=0,
            grid=grid,
            in_specs=[
                pl.BlockSpec((nq, tile_p), lambda i: (0, i)),          # patches (lane-dense)
                pl.BlockSpec((dim, nq), lambda i: (0, 0)),             # sign (+-1)
                pl.BlockSpec((2 * dim, 2 * dim), lambda i: (0, 0)),    # fused complex M
                pl.BlockSpec((nq, dim), lambda i: (0, 0)),             # states^T
            ],
            out_specs=pl.BlockSpec((nq, tile_p), lambda i: (0, i)),
        ),
        compiler_params=pltpu.CompilerParams(dimension_semantics=("parallel",)),
    )(xT, sgn_j, w_j, st_j)

    # --- place per-patch outputs back (exact inverse of permute_back + reshape),
    #     again as pure reshape/transpose.
    out = out[:, :P].reshape(kernel_size, kernel_size, B, nb, nb)    # (ri, ci, b, rb, cb)
    y = jnp.transpose(out, (2, 3, 0, 4, 1)).reshape(B, size, size)   # (b, rb, ri, cb, ci)
    return y


# ----------------------------------------------------------------------------
# Pure numpy reference (literal transcription of the PyTorch module) for checks
# ----------------------------------------------------------------------------
def _get_RZZ_np(qpair, rotation, nq):
    control, target = int(min(qpair)), int(max(qpair))
    diff = target - control
    upper_diff = nq - target
    b1 = np.exp(1j * rotation / 2.0)
    b2 = np.exp(-1j * rotation / 2.0)
    core = np.diag(np.array([b2, b1, b1, b2], dtype=np.complex128))
    op = np.kron(core, np.eye(2 ** (control - 1)))
    if diff > 1:
        n = op.shape[0]
        ou, ol = op[: n // 2, : n // 2], op[n // 2:, n // 2:]
        scaler = np.eye(2 ** (diff - 1))
        op = np.kron(_P0, np.kron(scaler, ou)) + np.kron(_P1, np.kron(scaler, ol))
    if upper_diff > 0:
        op = np.kron(np.eye(2 ** upper_diff), op)
    return op


def _ref_forward(x_bss, weight, size, ksize):
    nq = ksize * ksize
    B = x_bss.shape[0]
    h = _all_H(nq)
    sign = _sign_matrix(nq)
    states = _states(nq)
    cnot = _cnot_ring(nq)
    rx = _rx_all(np.asarray(weight, np.float32).reshape(-1), nq)
    tuples = [(i, j) for i in range(1, nq + 1) for j in range(i + 1, nq + 1)]
    perm, pback = _permutations(size, ksize)

    xr = np.asarray(x_bss, np.float32).reshape(B, size * size // 2, 2)
    xp = xr[:, perm, :].reshape(B * size * size // nq, nq)
    outs = []
    for p in range(xp.shape[0]):
        xf = xp[p]
        rz = np.diag(np.exp(np.sum(sign * (xf / (2 * 1j)), axis=-1)))
        ops = [_get_RZZ_np(t, xf[t[0] - 1] * xf[t[1] - 1], nq) for t in tuples]
        rzz = ops[-1]
        for i in range(0, len(ops) - 1):
            rzz = rzz @ ops[len(ops) - 2 - i]
        final = cnot @ rx @ rzz @ rz @ h
        probs = np.abs(final[:, 0]) ** 2
        outs.append(probs @ states)
    out = np.stack(outs).reshape(B, size * size // ksize, ksize)
    out = out[:, pback, :].reshape(B, size, size)
    return out.astype(np.float32)


if __name__ == "__main__":
    B, size, kernel_size = 2, 16, 2          # x: (2, 1, 16, 16) NCHW, C=1 (C*H*W == size^2)
    key = jax.random.PRNGKey(0)
    kx, kw = jax.random.split(key)
    x = jax.random.normal(kx, (B, 1, size, size), dtype=jnp.float32)
    # deterministic stand-in for nn.Parameter(torch.randn(kernel_size, kernel_size))
    weight = jax.random.normal(kw, (kernel_size, kernel_size), dtype=jnp.float32)

    y = quantum_conv2d(x, weight, kernel_size=kernel_size, size=size)
    y = jax.block_until_ready(y)

    y_ref = _ref_forward(np.asarray(x).reshape(B, size, size), np.asarray(weight),
                         size, kernel_size)
    # Tolerance note: the two in-kernel dots now use the MXU's *default* f32 matmul
    # decomposition (multi-pass bf16) instead of precision=HIGHEST, per the perf
    # guidance.  1e-2 comfortably covers that numerical difference while still
    # catching any real layout / phase / constant bug (those produce O(0.1..1) errors).
    np.testing.assert_allclose(np.asarray(y), y_ref, rtol=1e-2, atol=1e-2)
    print("KERNEL_OK")
</pallas_src>

<mosaic_0001>
module attributes {stable_mosaic.version = 11 : i64} {
  func.func @_qconv_kernel(%arg0: i32, %arg1: memref<4x128xf32, #tpu.memory_space<vmem>>, %arg2: memref<16x4xf32, #tpu.memory_space<vmem>>, %arg3: memref<32x32xf32, #tpu.memory_space<vmem>>, %arg4: memref<4x16xf32, #tpu.memory_space<vmem>>, %arg5: memref<4x128xf32, #tpu.memory_space<vmem>>) attributes {dimension_semantics = [#tpu.dimension_semantics<parallel>], iteration_bounds = array<i64: 1>, scalar_prefetch = 0 : i64, scratch_operands = 0 : i64, tpu.core_type = #tpu.core_type<tc>, window_params = [{transform_indices = @transform_0, window_bounds = array<i64: 4, 128>}, {pipeline_mode = #tpu.pipeline_mode<synchronous>, transform_indices = @transform_1, window_bounds = array<i64: 16, 4>}, {pipeline_mode = #tpu.pipeline_mode<synchronous>, transform_indices = @transform_2, window_bounds = array<i64: 32, 32>}, {pipeline_mode = #tpu.pipeline_mode<synchronous>, transform_indices = @transform_3, window_bounds = array<i64: 4, 16>}, {transform_indices = @transform_4, window_bounds = array<i64: 4, 128>}]} {
    %c0 = arith.constant 0 : index
    %c0_0 = arith.constant 0 : index
    %0 = vector.load %arg1[%c0, %c0_0] : memref<4x128xf32, #tpu.memory_space<vmem>>, vector<4x128xf32>
    %cst = arith.constant 5.000000e-01 : f32
    %1 = vector.broadcast %cst : f32 to vector<4x128xf32>
    %2 = arith.mulf %1, %0 : vector<4x128xf32>
    %c0_1 = arith.constant 0 : index
    %c0_2 = arith.constant 0 : index
    %3 = vector.load %arg2[%c0_1, %c0_2] : memref<16x4xf32, #tpu.memory_space<vmem>>, vector<16x4xf32>
    %4 = vector.extract_strided_slice %3 {offsets = [0, 0], sizes = [16, 1], strides = [1, 1]} : vector<16x4xf32> to vector<16x1xf32>
    %5 = vector.extract_strided_slice %2 {offsets = [0, 0], sizes = [1, 128], strides = [1, 1]} : vector<4x128xf32> to vector<1x128xf32>
    %6 = vector.broadcast %4 : vector<16x1xf32> to vector<16x128xf32>
    %7 = vector.broadcast %5 : vector<1x128xf32> to vector<16x128xf32>
    %8 = arith.mulf %6, %7 : vector<16x128xf32>
    %9 = vector.extract_strided_slice %3 {offsets = [0, 1], sizes = [16, 1], strides = [1, 1]} : vector<16x4xf32> to vector<16x1xf32>
    %10 = vector.extract_strided_slice %2 {offsets = [1, 0], sizes = [1, 128], strides = [1, 1]} : vector<4x128xf32> to vector<1x128xf32>
    %11 = vector.broadcast %9 : vector<16x1xf32> to vector<16x128xf32>
    %12 = vector.broadcast %10 : vector<1x128xf32> to vector<16x128xf32>
    %13 = arith.mulf %11, %12 : vector<16x128xf32>
    %14 = arith.addf %8, %13 : vector<16x128xf32>
    %15 = vector.extract_strided_slice %3 {offsets = [0, 2], sizes = [16, 1], strides = [1, 1]} : vector<16x4xf32> to vector<16x1xf32>
    %16 = vector.extract_strided_slice %2 {offsets = [2, 0], sizes = [1, 128], strides = [1, 1]} : vector<4x128xf32> to vector<1x128xf32>
    %17 = vector.broadcast %15 : vector<16x1xf32> to vector<16x128xf32>
    %18 = vector.broadcast %16 : vector<1x128xf32> to vector<16x128xf32>
    %19 = arith.mulf %17, %18 : vector<16x128xf32>
    %20 = arith.addf %14, %19 : vector<16x128xf32>
    %21 = vector.extract_strided_slice %3 {offsets = [0, 3], sizes = [16, 1], strides = [1, 1]} : vector<16x4xf32> to vector<16x1xf32>
    %22 = vector.extract_strided_slice %2 {offsets = [3, 0], sizes = [1, 128], strides = [1, 1]} : vector<4x128xf32> to vector<1x128xf32>
    %23 = vector.broadcast %21 : vector<16x1xf32> to vector<16x128xf32>
    %24 = vector.broadcast %22 : vector<1x128xf32> to vector<16x128xf32>
    %25 = arith.mulf %23, %24 : vector<16x128xf32>
    %26 = arith.addf %20, %25 : vector<16x128xf32>
    %27 = arith.mulf %2, %2 : vector<4x128xf32>
    %cst_3 = arith.constant dense<0.000000e+00> : vector<128xf32>
    %28 = vector.multi_reduction <add>, %27, %cst_3 [0] : vector<4x128xf32> to vector<128xf32>
    %29 = vector.shape_cast %28 : vector<128xf32> to vector<1x128xf32>
    %30 = vector.broadcast %29 : vector<1x128xf32> to vector<16x128xf32>
    %31 = arith.subf %30, %26 : vector<16x128xf32>
    %32 = arith.mulf %26, %26 : vector<16x128xf32>
    %33 = arith.subf %31, %32 : vector<16x128xf32>
    %34 = math.cos %33 : vector<16x128xf32>
    %35 = math.sin %33 : vector<16x128xf32>
    %36 = tpu.concatenate %34, %35 in 0 : vector<16x128xf32>, vector<16x128xf32> -> vector<32x128xf32>
    %c0_4 = arith.constant 0 : index
    %c0_5 = arith.constant 0 : index
    %37 = vector.load %arg3[%c0_4, %c0_5] : memref<32x32xf32, #tpu.memory_space<vmem>>, vector<32x32xf32>
    %cst_6 = arith.constant dense<0.000000e+00> : vector<32x128xf32>
    %38 = tpu.matmul %37, %36, %cst_6 {dimension_numbers = #tpu.dot_dimension_numbers<[1], [0], [0], [1], [0, 0, 1, 1], [], []>} : vector<32x32xf32>, vector<32x128xf32>, vector<32x128xf32> -> vector<32x128xf32>
    %39 = vector.extract_strided_slice %38 {offsets = [0, 0], sizes = [16, 128], strides = [1, 1]} : vector<32x128xf32> to vector<16x128xf32>
    %40 = vector.extract_strided_slice %38 {offsets = [16, 0], sizes = [16, 128], strides = [1, 1]} : vector<32x128xf32> to vector<16x128xf32>
    %41 = arith.mulf %39, %39 : vector<16x128xf32>
    %42 = arith.mulf %40, %40 : vector<16x128xf32>
    %43 = arith.addf %41, %42 : vector<16x128xf32>
    %c0_7 = arith.constant 0 : index
    %c0_8 = arith.constant 0 : index
    %44 = vector.load %arg4[%c0_7, %c0_8] : memref<4x16xf32, #tpu.memory_space<vmem>>, vector<4x16xf32>
    %cst_9 = arith.constant dense<0.000000e+00> : vector<4x128xf32>
    %45 = tpu.matmul %44, %43, %cst_9 {dimension_numbers = #tpu.dot_dimension_numbers<[1], [0], [0], [1], [0, 0, 1, 1], [], []>} : vector<4x16xf32>, vector<16x128xf32>, vector<4x128xf32> -> vector<4x128xf32>
    %c0_10 = arith.constant 0 : index
    %c0_11 = arith.constant 0 : index
    %46 = vector.load %arg5[%c0_10, %c0_11] : memref<4x128xf32, #tpu.memory_space<vmem>>, vector<4x128xf32>
    tpu.vector_store %arg5[%c0_10, %c0_11], %45 {strides = array<i32>} : memref<4x128xf32, #tpu.memory_space<vmem>>, vector<4x128xf32>,
    return
  }
  func.func @transform_0(%arg0: i32) -> (i32, i32) {
    %c0_i32 = arith.constant 0 : i32
    %c0_i32_0 = arith.constant 0 : i32
    return %c0_i32, %arg0 : i32, i32
  }
  func.func @transform_1(%arg0: i32) -> (i32, i32) {
    %c0_i32 = arith.constant 0 : i32
    %c0_i32_0 = arith.constant 0 : i32
    %c0_i32_1 = arith.constant 0 : i32
    return %c0_i32, %c0_i32_0 : i32, i32
  }
  func.func @transform_2(%arg0: i32) -> (i32, i32) {
    %c0_i32 = arith.constant 0 : i32
    %c0_i32_0 = arith.constant 0 : i32
    %c0_i32_1 = arith.constant 0 : i32
    return %c0_i32, %c0_i32_0 : i32, i32
  }
  func.func @transform_3(%arg0: i32) -> (i32, i32) {
    %c0_i32 = arith.constant 0 : i32
    %c0_i32_0 = arith.constant 0 : i32
    %c0_i32_1 = arith.constant 0 : i32
    return %c0_i32, %c0_i32_0 : i32, i32
  }
  func.func @transform_4(%arg0: i32) -> (i32, i32) {
    %c0_i32 = arith.constant 0 : i32
    %c0_i32_0 = arith.constant 0 : i32
    return %c0_i32, %arg0 : i32, i32
  }
}

</mosaic_0001>

<bundles_post_ra>
// kernel: tpu_custom_call.1
= control target key start
LH: loop header
LB: loop body
LE: loop exit
PB: predicated region body
PF: predicated region fallthrough
CT: control target
= control target key end

     0   :  { %9 = vsyncpa [#allocation3], 0  ;;  %s1032_s0 = inlined_call_operand.vmem [shape: f32[4,128], index: 0, kind: input, shape index: {}]   ;;  %s1033_s1 = inlined_call_operand.vmem [shape: f32[16,4], index: 1, kind: input, shape index: {}]   ;;  %s1034_s2 = inlined_call_operand.hbm [shape: f32[32,32], index: 2, kind: input, shape index: {}]   ;;  %s1035_s3 = inlined_call_operand.vmem [shape: f32[4,16], index: 3, kind: input, shape index: {}]   ;;  %s1036_s4 = inlined_call_operand.hbm [shape: f32[4,128], index: 4, kind: output, shape index: {}]  }
   0x1   :  { %10 = vsyncpa [#allocation4], 0  ;;  %s879_s15 = smov [#allocation2]   ;;  %s831_s19 = scalar_lea.hbm %s1034_s2, 512 }
   0x2   :  { %s20_s16 = sshll.u32 %s879_s15, 4  ;;  %p832_p0 = scmp.ne.s32.totalorder %s1034_s2, %s831_s19  ;;  %s21_s16 = int_to_ptr.vmem [resolvable:$true] %s20_s16 }
   0x3   :  { %p835_p1 = scmp.lt.u32.totalorder %s831_s19, %s1034_s2 }
   0x5   :  { %p837_p2 = pnand %p835_p1, %p832_p0 }
   0x7   :  { %840 = shalt.err (!%p837_p2)
}
   0x8   :  { %s841_s24 = scalar_lea.vmem %s21_s16, 512  ;;  %p846_p4 = scmp.lt.s32.totalorder %s21_s16, %s21_s16 }
   0x9   :  { %p842_p3 = scmp.ne.s32.totalorder %s21_s16, %s841_s24  ;;  %p847_p5 = scmp.lt.s32.totalorder %s841_s24, %s841_s24 }
   0xb   :  { %p848_p6 = por %p847_p5, %p846_p4 }
   0xd   :  { %p849_p7 = pnand %p848_p6, %p842_p3 }
   0xf   :  { %852 = shalt.err (!%p849_p7)
}
  0x10   :  { %s880_s25 = smov 128   ;;  %s881_s26 = smov 8  }
  0x11   :  { %26 = dma.hbm_to_vmem [thread:$0]  %s1034_s2, 512, %s21_s16, [#allocation3], %s880_s25, %s880_s25, %s881_s26  }
  0x12   :  { %875 = dma.done.wait [#allocation3], 512  }
  0x13   :  { %876 = vsyncadd [#allocation3], 4294966784  ;;  %v882_v0 = vmov 1   ;;  %v883_v1 = vmov 0   ;;  %v34_v2 = vld [vmem:[%s1033_s1] sm:$0xff]  ;;  %v35_v3 = vld [vmem:[%s1033_s1 + $0x8] sm:$0xff]  ;;  %v46_v10 = vlaneseq }
  0x14   :  { %818 = vset.pattern.permute.xlu1 %v882_v0  ;;  %817 = vset.pattern.permute.xlu0 %v883_v1  ;;  %v884_v4 = vmov 2   ;;  %v885_v5 = vmov 3   ;;  %v32_v6 = vld [vmem:[%s1032_s0] sm:$0xf]  ;;  %vm101_vm0 = vcmask 1043456   ;;  %vm533_vm1 = vcmask 261120  }
  0x15   :  { %53 = vperm.xlu1 %818, %v34_v2   ;;  %38 = vperm.xlu0 %817, %v34_v2   ;;  %v33_v7 = vmul.f32 0.5, %v32_v6  ;;  %v529_v11 = vld [vmem:[#allocation2] sm:$0xff]  ;;  %v47_v13 = vshrl.u32 %v46_v10, 7  ;;  %s895_s8 = smov [#allocation5]  }
  0x16   :  { %768 = vmatprep.mubr.msk.f32.mxu0 %vm533_vm1, %v529_v11  ;;  %s719_s9 = sshll.u32 %s895_s8, 4  ;;  %s720_s9 = int_to_ptr.vmem [resolvable:$true] %s719_s9 }
  0x17   :  { %v100_v8 = vmul.f32 %v33_v7, %v33_v7  ;;  %v62_v17 = vsub.s32 1, %v47_v13  ;;  %v48_v18 = vsub.s32 0, %v47_v13  ;;  %v78_v20 = vsub.s32 2, %v47_v13  ;;  %s853_s10 = scalar_lea.vmem %s720_s9, 64  ;;  %p858_p9 = scmp.lt.s32.totalorder %s720_s9, %s720_s9 }
  0x18   :  { %v94_v27 = vsub.s32 3, %v47_v13  ;;  %p854_p8 = scmp.ne.s32.totalorder %s720_s9, %s853_s10  ;;  %p859_p10 = scmp.lt.s32.totalorder %s853_s10, %s853_s10 }
  0x19   :  { %57 = vperm.xlu1 %818, %v35_v3   ;;  %43 = vperm.xlu0 %817, %v35_v3   ;;  %v102_v9 = vsel %vm101_vm0, %v100_v8, 0.0  ;;  %v63_v23 = vrot.slane %v33_v7, %v62_v17  ;;  %v49_v24 = vrot.slane %v33_v7, %v48_v18  ;;  %v79_v26 = vrot.slane %v33_v7, %v78_v20 }
  0x1a   :  { %v103_v12 = vrot.slane %v102_v9, 4  ;;  %v95_v37 = vrot.slane %v33_v7, %v94_v27  ;;  %v887_v17 = vmov 2475754826   ;;  %p860_p11 = por %p859_p10, %p858_p9 }
  0x1c   :  { %v104_v14 = vadd.f32 %v103_v12, %v102_v9  ;;  %p861_p12 = pnand %p860_p11, %p854_p8 }
  0x1d   :  { %820 = vset.pattern.permute.xlu1 %v884_v4  ;;  %819 = vset.pattern.permute.xlu0 %v884_v4 }
  0x1e   :  { %73 = vperm.xlu1 %820, %v35_v3   ;;  %69 = vperm.xlu0 %819, %v34_v2   ;;  %v105_v19 = vrot.slane %v104_v14, 2 }
  0x20   :  { %v106_v25 = vadd.f32 %v105_v19, %v104_v14  ;;  %v888_v19 = vmov 2131351028  }
  0x22   :  { %821 = vset.pattern.permute.xlu1 %v885_v5  ;;  %822 = vset.pattern.permute.xlu0 %v885_v5  ;;  %v107_v34 = vrot.slane %v106_v25, 1 }
  0x23   :  { %85 = vperm.xlu1 %821, %v34_v2   ;;  %89 = vperm.xlu0 %822, %v35_v3  }
  0x24   :  { %v108_v41 = vadd.f32 %v107_v34, %v106_v25 }
  0x94   :  { %v54_v15 = vpop.permute.xlu1 %53  ;;  %v39_v16 = vpop.permute.xlu0 %38 }
  0x95   :  { %v64_v28 = vmul.f32 %v63_v23, %v54_v15  ;;  %v50_v29 = vmul.f32 %v49_v24, %v39_v16  ;;  %v886_v15 = vmov 683565275  }
  0x97   :  { %v66_v38 = vadd.f32 %v64_v28, %v50_v29  ;;  %v891_v29 = vmov 1326507024  }
  0x98   :  { %v58_v21 = vpop.permute.xlu1 %57  ;;  %v44_v22 = vpop.permute.xlu0 %43 }
  0x99   :  { %v65_v30 = vmul.f32 %v63_v23, %v58_v21  ;;  %v51_v31 = vmul.f32 %v49_v24, %v44_v22  ;;  %v889_v23 = vmov 2102212464  }
  0x9b   :  { %v67_v39 = vadd.f32 %v65_v30, %v51_v31 }
  0x9d   :  { %v74_v32 = vpop.permute.xlu1 %73  ;;  %v70_v33 = vpop.permute.xlu0 %69 }
  0x9e   :  { %v81_v35 = vmul.f32 %v79_v26, %v74_v32  ;;  %v80_v36 = vmul.f32 %v79_v26, %v70_v33  ;;  %v890_v26 = vmov 920167782  }
  0xa0   :  { %v83_v43 = vadd.f32 %v81_v35, %v67_v39  ;;  %v82_v44 = vadd.f32 %v80_v36, %v66_v38 }
  0xa2   :  { %v86_v40 = vpop.permute.xlu1 %85  ;;  %v90_v42 = vpop.permute.xlu0 %89 }
  0xa3   :  { %v96_v45 = vmul.f32 %v95_v37, %v86_v40  ;;  %v97_v46 = vmul.f32 %v95_v37, %v90_v42 }
  0xa5   :  { %v98_v47 = vadd.f32 %v96_v45, %v82_v44  ;;  %v99_v48 = vadd.f32 %v97_v46, %v83_v43 }
  0xa7   :  { %v109_v49 = vsub.f32 %v108_v41, %v98_v47  ;;  %v111_v50 = vmul.f32 %v98_v47, %v98_v47  ;;  %v110_v51 = vsub.f32 %v108_v41, %v99_v48  ;;  %v112_v52 = vmul.f32 %v99_v48, %v99_v48 }
  0xa9   :  { %v943_v53 = vsub.f32 %v109_v49, %v111_v50  ;;  %v945_v54 = vsub.f32 %v110_v51, %v112_v52 }
  0xab   :  { %v118_v55 = vand.u32 2139095040, %v943_v53  ;;  %v221_v56 = vand.u32 2139095040, %v945_v54  ;;  %v115_v57 = vand.u32 2147483647, %v943_v53  ;;  %v218_v58 = vand.u32 2147483647, %v945_v54 }
  0xac   :  { %vm117_vm0 = vcmp.lt.s32.totalorder %v943_v53, 0 }
  0xad   :  { %v119_v59 = vshrl.u32 %v118_v55, 23  ;;  %v222_v60 = vshrl.u32 %v221_v56, 23  ;;  %v122_v63 = vand.u32 8388607, %v115_v57  ;;  %v225_v0 = vand.u32 8388607, %v218_v58 }
  0xaf   :  { %v728_v61 = vadd.s32 4294967169, %v119_v59  ;;  %v732_v62 = vadd.s32 4294967169, %v222_v60  ;;  %v123_v3 = vor.u32 8388608, %v122_v63  ;;  %v226_v4 = vor.u32 8388608, %v225_v0 }
  0xb1   :  { %v125_v1 = vadd.s32 1, %v728_v61  ;;  %v228_v2 = vadd.s32 1, %v732_v62  ;;  %v959_v12 = vshll.u32 %v123_v3, 8  ;;  %v961_v13 = vshll.u32 %v226_v4, 8 }
  0xb3   :  { %vm126_vm2 = vcmp.gt.s32.totalorder %v125_v1, 0  ;;  %vm229_vm3 = vcmp.gt.s32.totalorder %v228_v2, 0 }
  0xb4   :  { %v127_v5 = vsel %vm126_vm2, %v125_v1, 0  ;;  %v230_v6 = vsel %vm229_vm3, %v228_v2, 0  ;;  %vm116_vm2 = vcmp.le.f32.partialorder %v115_v57, 0.7853982  ;;  %vm220_vm3 = vcmp.lt.s32.totalorder %v945_v54, 0 }
  0xb5   :  { %v129_v7 = vand.u32 31, %v127_v5  ;;  %v955_v8 = vand.u32 31, %v230_v6  ;;  %v128_v9 = vshrl.u32 %v127_v5, 5  ;;  %v957_v11 = vshrl.u32 %v230_v6, 5 }
  0xb7   :  { %v130_v10 = vsub.s32 32, %v129_v7  ;;  %v233_v14 = vsub.s32 32, %v955_v8  ;;  %v132_v16 = vshll.u32 %v886_v15, %v129_v7  ;;  %v135_v18 = vshll.u32 %v887_v17, %v129_v7 }
  0xb8   :  { %v138_v20 = vshll.u32 %v888_v19, %v129_v7  ;;  %v141_v25 = vshll.u32 %v889_v23, %v129_v7  ;;  %v144_v28 = vshll.u32 %v890_v26, %v129_v7  ;;  %vm147_vm4 = vcmp.lt.s32.totalorder %v128_v9, 1 }
  0xb9   :  { %v133_v21 = vshrl.u32 %v887_v17, %v130_v10  ;;  %v136_v22 = vshrl.u32 %v888_v19, %v130_v10  ;;  %v139_v24 = vshrl.u32 %v889_v23, %v130_v10  ;;  %v142_v27 = vshrl.u32 %v890_v26, %v130_v10 }
  0xba   :  { %v145_v30 = vshrl.u32 %v891_v29, %v130_v10  ;;  %v131_v31 = vshrl.u32 %v886_v15, %v130_v10  ;;  %vm149_vm5 = vcmp.lt.s32.totalorder %v128_v9, 3  ;;  %vm150_vm6 = vcmp.lt.s32.totalorder %v128_v9, 4 }
  0xbb   :  { %v134_v32 = vor.u32 %v133_v21, %v132_v16  ;;  %v137_v33 = vor.u32 %v136_v22, %v135_v18  ;;  %v140_v34 = vor.u32 %v139_v24, %v138_v20  ;;  %v143_v35 = vor.u32 %v142_v27, %v141_v25 }
  0xbc   :  { %v146_v36 = vor.u32 %v145_v30, %v144_v28  ;;  %v236_v44 = vshrl.u32 %v887_v17, %v233_v14  ;;  %vm148_vm7 = vcmp.lt.s32.totalorder %v128_v9, 2  ;;  %v235_v47 = vshll.u32 %v886_v15, %v955_v8 }
  0xbd   :  { %v151_v37 = vsel %vm147_vm4, %v131_v31, %v134_v32  ;;  %v152_v38 = vsel %vm150_vm6, %v140_v34, 2102212464  ;;  %v155_v39 = vsel %vm147_vm4, %v134_v32, %v137_v33  ;;  %v159_v40 = vsel %vm147_vm4, %v137_v33, %v140_v34 }
  0xbe   :  { %v153_v41 = vsel %vm149_vm5, %v137_v33, %v152_v38  ;;  %v156_v42 = vsel %vm150_vm6, %v143_v35, 920167782  ;;  %v160_v43 = vsel %vm150_vm6, %v146_v36, 1326507024  ;;  %v238_v51 = vshll.u32 %v887_v17, %v955_v8 }
  0xbf   :  { %v157_v45 = vsel %vm149_vm5, %v140_v34, %v156_v42  ;;  %v161_v46 = vsel %vm149_vm5, %v143_v35, %v160_v43  ;;  %v154_v48 = vsel %vm148_vm7, %v151_v37, %v153_v41  ;;  %v237_v60 = vor.u32 %v236_v44, %v235_v47 }
  0xc0   :  { %v158_v49 = vsel %vm148_vm7, %v155_v39, %v157_v45  ;;  %v162_v50 = vsel %vm148_vm7, %v159_v40, %v161_v46  ;;  %v239_v61 = vshrl.u32 %v888_v19, %v233_v14  ;;  %v241_v62 = vshll.u32 %v888_v19, %v955_v8 }
  0xc1   :  { %v967_v52 = vmul.u32.u64.low %v959_v12, %v162_v50  ;;  %v968_v55 = vmul.u32.u64.high %v959_v12, %v162_v50, %v967_v52  ;;  %v971_v56 = vmul.u32.u64.low %v959_v12, %v158_v49  ;;  %v972_v59 = vmul.u32.u64.high %v959_v12, %v158_v49, %v971_v56 }
  0xc2   :  { %v242_v63 = vshrl.u32 %v889_v23, %v233_v14  ;;  %v234_v0 = vshrl.u32 %v886_v15, %v233_v14  ;;  %v244_v1 = vshll.u32 %v889_v23, %v955_v8  ;;  %v245_v2 = vshrl.u32 %v890_v26, %v233_v14 }
  0xc3   :  { %v248_v3 = vshrl.u32 %v891_v29, %v233_v14  ;;  %v170_v4 = vmul.u32 %v959_v12, %v154_v48  ;;  %v240_v5 = vor.u32 %v239_v61, %v238_v51  ;;  %v247_v7 = vshll.u32 %v890_v26, %v955_v8 }
  0xc4   :  { %v243_v6 = vor.u32 %v242_v63, %v241_v62  ;;  %vm172_vm8 = vc.u32 %v968_v55, %v971_v56  ;;  %v173_v9 = vadd.s32 1, %v972_v59  ;;  %v246_v10 = vor.u32 %v245_v2, %v244_v1 }
  0xc5   :  { %vm250_vm9 = vcmp.lt.s32.totalorder %v957_v11, 1  ;;  %v249_v16 = vor.u32 %v248_v3, %v247_v7  ;;  %vm252_vm10 = vcmp.lt.s32.totalorder %v957_v11, 3  ;;  %vm253_vm11 = vcmp.lt.s32.totalorder %v957_v11, 4 }
  0xc6   :  { %v258_v15 = vsel %vm250_vm9, %v237_v60, %v240_v5  ;;  %v174_v14 = vsel %vm172_vm8, %v173_v9, %v972_v59  ;;  %v255_v12 = vsel %vm253_vm11, %v243_v6, 2102212464  ;;  %v259_v17 = vsel %vm253_vm11, %v246_v10, 920167782 }
  0xc7   :  { %v262_v18 = vsel %vm250_vm9, %v240_v5, %v243_v6  ;;  %v175_v19 = vadd.s32 %v174_v14, %v170_v4  ;;  %vm251_vm12 = vcmp.lt.s32.totalorder %v957_v11, 2  ;;  %v260_v8 = vsel %vm252_vm10, %v243_v6, %v259_v17 }
  0xc8   :  { %v263_v20 = vsel %vm253_vm11, %v249_v16, 1326507024  ;;  %v254_v21 = vsel %vm250_vm9, %v234_v0, %v237_v60  ;;  %v256_v22 = vsel %vm252_vm10, %v240_v5, %v255_v12  ;;  %v261_v23 = vsel %vm251_vm12, %v258_v15, %v260_v8 }
  0xc9   :  { %v264_v24 = vsel %vm252_vm10, %v246_v10, %v263_v20  ;;  %v176_v25 = vadd.s32 536870912, %v175_v19  ;;  %v986_v27 = vmul.u32.u64.low %v961_v13, %v261_v23  ;;  %v987_v28 = vmul.u32.u64.high %v961_v13, %v261_v23, %v986_v27 }
  0xca   :  { %v265_v26 = vsel %vm251_vm12, %v262_v18, %v264_v24  ;;  %v257_v32 = vsel %vm251_vm12, %v254_v21, %v256_v22  ;;  %v171_v48 = vadd.s32 %v971_v56, %v968_v55  ;;  %vm219_vm4 = vcmp.le.f32.partialorder %v218_v58, 0.7853982 }
  0xcb   :  { %v990_v29 = vmul.u32.u64.low %v961_v13, %v265_v26  ;;  %v991_v30 = vmul.u32.u64.high %v961_v13, %v265_v26, %v990_v29  ;;  %v177_v31 = vshrl.u32 %v176_v25, 30  ;;  %v276_v11 = vadd.s32 1, %v987_v28 }
  0xcc   :  { %v273_v34 = vmul.u32 %v961_v13, %v257_v32  ;;  %vm207_vm9 = vweird.f32 %v943_v53 }
  0xcd   :  { %v178_v33 = vshll.u32 %v177_v31, 30  ;;  %vm275_vm13 = vc.u32 %v991_v30, %v986_v27  ;;  %v274_v4 = vadd.s32 %v986_v27, %v991_v30  ;;  %v201_v18 = vsub.s32 4, %v177_v31 }
  0xce   :  { %v277_v36 = vsel %vm275_vm13, %v276_v11, %v987_v28 }
  0xcf   :  { %v179_v35 = vsub.s32 %v175_v19, %v178_v33  ;;  %v278_v37 = vadd.s32 %v277_v36, %v273_v34  ;;  %v202_v22 = vsel %vm117_vm0, %v201_v18, %v177_v31 }
  0xd0   :  { %v204_v24 = vsel %vm116_vm2, 0, %v202_v22 }
  0xd1   :  { %v181_v38 = vsub.s32 0, %v179_v35  ;;  %v279_v39 = vadd.s32 536870912, %v278_v37  ;;  %v414_v29 = vadd.s32 3, %v204_v24  ;;  %v208_v32 = vand.u32 3, %v204_v24 }
  0xd3   :  { %v729_v40 = vmin.u32 %v181_v38, %v179_v35  ;;  %v280_v41 = vshrl.u32 %v279_v39, 30  ;;  %v415_v34 = vand.u32 3, %v414_v29  ;;  %vm210_vm5 = vcmp.eq.s32.totalorder %v208_v32, 0 }
  0xd4   :  { %vm213_vm6 = vcmp.eq.s32.totalorder %v208_v32, 2  ;;  %vm209_vm10 = vcmp.lt.s32.totalorder %v208_v32, 2 }
  0xd5   :  { %v183_v42 = vclz %v729_v40  ;;  %v281_v43 = vshll.u32 %v280_v41, 30  ;;  %v304_v21 = vsub.s32 4, %v280_v41  ;;  %vm417_vm7 = vcmp.eq.s32.totalorder %v415_v34, 0 }
  0xd6   :  { %vm420_vm8 = vcmp.eq.s32.totalorder %v415_v34, 2  ;;  %vm416_vm12 = vcmp.lt.s32.totalorder %v415_v34, 2 }
  0xd7   :  { %v730_v44 = vadd.s32 4294967294, %v183_v42  ;;  %v282_v45 = vsub.s32 %v278_v37, %v281_v43  ;;  %v305_v25 = vsel %vm220_vm3, %v304_v21, %v280_v41 }
  0xd8   :  { %v307_v28 = vsel %vm219_vm4, 0, %v305_v25 }
  0xd9   :  { %vm731_vm14 = vcmp.lt.s32.totalorder %v730_v44, 0  ;;  %v284_v47 = vsub.s32 0, %v282_v45  ;;  %v518_v11 = vadd.s32 3, %v307_v28 }
  0xda   :  { %v186_v46 = vsel %vm731_vm14, 0, %v730_v44 }
  0xdb   :  { %v187_v13 = vsub.s32 32, %v186_v46  ;;  %v191_v49 = vsub.s32 4294967266, %v186_v46  ;;  %v733_v50 = vmin.u32 %v284_v47, %v282_v45  ;;  %v188_v51 = vshll.u32 %v179_v35, %v186_v46 }
  0xdc   :  { %v311_v35 = vand.u32 3, %v307_v28  ;;  %v519_v37 = vand.u32 3, %v518_v11 }
  0xdd   :  { %v189_v52 = vshrl.u32 %v171_v48, %v187_v13  ;;  %v192_v59 = vadd.s32 127, %v191_v49  ;;  %v286_v60 = vclz %v733_v50 }
  0xde   :  { %vm312_vm11 = vcmp.lt.s32.totalorder %v311_v35, 2  ;;  %vm313_vm13 = vcmp.eq.s32.totalorder %v311_v35, 0  ;;  %vm316_vm14 = vcmp.eq.s32.totalorder %v311_v35, 2 }
  0xdf   :  { %v190_v61 = vor.u32 %v189_v52, %v188_v51  ;;  %v193_v62 = vshll.u32 %v192_v59, 23  ;;  %v734_v63 = vadd.s32 4294967294, %v286_v60 }
  0xe1   :  { %v194_v0 = vor.u32 4788187, %v193_v62  ;;  %vm735_vm15 = vcmp.lt.s32.totalorder %v734_v63, 0  ;;  %v197_v2 = vcvt.s32.f32 %v190_v61 }
  0xe2   :  { %v289_v3 = vsel %vm735_vm15, 0, %v734_v63  ;;  %vm524_vm15 = vcmp.eq.s32.totalorder %v519_v37, 2  ;;  %v530_v63 = vld [vmem:[#allocation2 + $0x8] sm:$0xff] }
  0xe3   :  { %v195_v1 = vand.u32 2147483647, %v194_v0  ;;  %v290_v5 = vsub.s32 32, %v289_v3  ;;  %v294_v6 = vsub.s32 4294967266, %v289_v3  ;;  %v291_v56 = vshll.u32 %v282_v45, %v289_v3  ;;  %v531_v0 = vld [vmem:[#allocation2 + $0x10] sm:$0xff] }
  0xe5   :  { %v198_v55 = vmul.f32 %v197_v2, %v195_v1  ;;  %v292_v7 = vshrl.u32 %v274_v4, %v290_v5  ;;  %v295_v9 = vadd.s32 127, %v294_v6  ;;  %v892_v1 = vmov 0.0|0.0  }
  0xe6   :  { %789 = vmatprep.subr.bf16.mxu1 %v892_v1 }
  0xe7   :  { %v199_v10 = vxor.u32 2147483648, %v198_v55  ;;  %v293_v16 = vor.u32 %v292_v7, %v291_v56  ;;  %v296_v15 = vshll.u32 %v295_v9, 23 }
  0xe9   :  { %v200_v14 = vsel %vm117_vm0, %v199_v10, %v198_v55  ;;  %v297_v17 = vor.u32 4788187, %v296_v15  ;;  %v300_v8 = vcvt.s32.f32 %v293_v16  ;;  %vm521_vm0 = vcmp.eq.s32.totalorder %v519_v37, 0  ;;  %v637_v15 = vld [vmem:[%s1035_s3] sm:$0xf] }
  0xea   :  { %v203_v12 = vsel %vm116_vm2, %v943_v53, %v200_v14  ;;  %vm520_vm2 = vcmp.lt.s32.totalorder %v519_v37, 2  ;;  %v894_v53 = vmov 0.0  }
  0xeb   :  { %823 = vcosq.f32 %v203_v12  ;;  %v298_v19 = vand.u32 2147483647, %v297_v17 }
  0xec   :  { %825 = vsinq.f32 %v203_v12 }
  0xed   :  { %v301_v20 = vmul.f32 %v300_v8, %v298_v19 }
  0xef   :  { %v302_v23 = vxor.u32 2147483648, %v301_v20 }
  0xf1   :  { %v303_v57 = vsel %vm220_vm3, %v302_v23, %v301_v20  ;;  %vm310_vm3 = vweird.f32 %v945_v54 }
  0xf2   :  { %v306_v26 = vsel %vm219_vm4, %v945_v54, %v303_v57  ;;  %v532_v54 = vld [vmem:[#allocation2 + $0x18] sm:$0xff]  ;;  %vm893_vm4 = vmmov 0  }
  0xf3   :  { %827 = vcosq.f32 %v306_v26  ;;  %778 = vmatprep.mubr.msk.f32.mxu1 %vm893_vm4, %v894_v53 }
  0xf4   :  { %829 = vsinq.f32 %v306_v26 }
  0xf5   :  { %v824_v27 = vpop.eup %823 }
  0xf6   :  { %v826_v30 = vpop.eup %825  ;;  %v214_v31 = vxor.u32 2147483648, %v824_v27 }
  0xf7   :  { %v211_v33 = vxor.u32 2147483648, %v826_v30 }
  0xf8   :  { %v215_v58 = vsel %vm213_vm6, %v214_v31, %v826_v30  ;;  %v422_v40 = vsel %vm420_vm8, %v214_v31, %v826_v30 }
  0xf9   :  { %v212_v36 = vsel %vm210_vm5, %v824_v27, %v211_v33  ;;  %v419_v39 = vsel %vm417_vm7, %v824_v27, %v211_v33 }
  0xfa   :  { %v216_v42 = vsel %vm209_vm10, %v212_v36, %v215_v58  ;;  %v423_v46 = vsel %vm416_vm12, %v419_v39, %v422_v40 }
  0xfb   :  { %v217_v48 = vsel %vm207_vm9, nan, %v216_v42  ;;  %v424_v59 = vsel %vm207_vm9, nan, %v423_v46 }
  0xfd   :  { %v828_v38 = vpop.eup %827 }
  0xfe   :  { %v830_v41 = vpop.eup %829  ;;  %v317_v43 = vxor.u32 2147483648, %v828_v38 }
  0xff   :  { %v314_v44 = vxor.u32 2147483648, %v830_v41 }
 0x100   :  { %v318_v45 = vsel %vm316_vm14, %v317_v43, %v830_v41  ;;  %v526_v47 = vsel %vm524_vm15, %v317_v43, %v830_v41 }
 0x101   :  { %v315_v13 = vsel %vm313_vm13, %v828_v38, %v314_v44  ;;  %v523_v49 = vsel %vm521_vm0, %v828_v38, %v314_v44 }
 0x102   :  { %v319_v50 = vsel %vm312_vm11, %v315_v13, %v318_v45  ;;  %v527_v51 = vsel %vm520_vm2, %v523_v49, %v526_v47 }
 0x103   :  { %v320_v52 = vsel %vm310_vm3, nan, %v319_v50  ;;  %v528_v60 = vsel %vm310_vm3, nan, %v527_v51 }
 0x104   :  { %v781_v61 = vpack.c.bf16 %v320_v52, %v217_v48  ;;  %v785_v62 = vpack.c.bf16 %v528_v60, %v424_v59 }
 0x106   :  { %782 = vmatprep.subr.bf16.mxu0 %v781_v61 }
 0x107   :  { %784 = vmatpush3.bf16.msra.mxu0 %v781_v61 }
 0x108   :  { %786 = vmatprep.subr.bf16.mxu0 %v785_v62 }
 0x10b   :  { %788 = vmatpush3.bf16.msra.mxu0 %v785_v62 }
 0x10e   :  { %769 = vmatmul.mubr.msk.f32.vlgmr.msra.gmra.mrb[0].mxu0 %vm533_vm1, %v530_v63 }
 0x10f   :  { %771 = vmatprep.mubr.msk.f32.mxu0 %vm533_vm1, %v531_v0 }
 0x112   :  { %772 = vmatmul.mubr.msk.f32.gmra.mrb[2].mxu0 %vm533_vm1, %v532_v54  ;;  %vm638_vm1 = vcmask 130048  }
 0x1e1   :  { %v770_v2 = vpop.f32.mrb[0].mxu0 }
 0x1e2   :  { %v612_v3 = vpop.f32.mrb[1].mxu0  ;;  %v632_v5 = vmul.f32 %v770_v2, %v770_v2 }
 0x1e3   :  { %v631_v56 = vmul.f32 %v612_v3, %v612_v3 }
 0x1e5   :  { %v773_v4 = vpop.f32.mrb[2].mxu0 }
 0x1e6   :  { %v634_v6 = vmul.f32 %v773_v4, %v773_v4  ;;  %v622_v55 = vpop.f32.mrb[3].mxu0 }
 0x1e7   :  { %v633_v7 = vmul.f32 %v622_v55, %v622_v55 }
 0x1e8   :  { %v636_v9 = vadd.f32 %v634_v6, %v632_v5 }
 0x1e9   :  { %v635_v10 = vadd.f32 %v633_v7, %v631_v56 }
 0x1eb   :  { %v790_v16 = vpack.c.bf16 %v636_v9, %v635_v10 }
 0x1ed   :  { %791 = vmatpush3.bf16.msra.mxu1 %v790_v16 }
 0x1f0   :  { %779 = vmatmul.mubr.msk.f32.vlgmr.msra.gmra.mrb[0].mxu1 %vm638_vm1, %v637_v15 }
 0x2c3   :  { %v708_v14 = vpop.f32.mrb[0].mxu1 }
 0x2c4   :  { %712 = vst [vmem:[#allocation5] sm:$0xf] %v708_v14  ;;  %v780_v12 = vpop.f32.mrb[1].mxu1 }
 0x2c5   :  { %864 = shalt.err (!%p861_p12)
}
 0x2c6   :  { %s865_s13 = scalar_lea.hbm %s1036_s4, 64 }
 0x2c7   :  { %p866_p13 = scmp.ne.s32.totalorder %s1036_s4, %s865_s13  ;;  %p869_p0 = scmp.lt.u32.totalorder %s865_s13, %s1036_s4 }
 0x2c9   :  { %p871_p1 = pnand %p869_p0, %p866_p13 }
 0x2cb   :  { %874 = shalt.err (!%p871_p1)
}
 0x2cc   :  { %722 = dma.vmem_to_hbm [thread:$0]  %s720_s9, 64, %s1036_s4, [#allocation4]  }
 0x2cd   :  { %877 = dma.done.wait [#allocation4], 64  }
 0x2ce   :  { %878 = vsyncadd [#allocation4], 4294967232 }
 0x2cf   :  { %726 = vsyncpa [#allocation3], 1 }
 0x2d0   :  { %727 = vsyncpa [#allocation4], 1 }

</bundles_post_ra>
